<compile_context>
chip_gen: v5e
topology: v5e:2x2
jax: 0.10.0
libtpu: 0.0.40
codegen_flags: <defaults>
</compile_context>

<pallas_src>
import math

import jax
import jax.numpy as jnp
from jax.experimental import pallas as pl
from jax.experimental.pallas import tpu as pltpu

H = 4                      # number of heads
D_MODEL = 32               # model dim (d_model % h == 0)
D_K = D_MODEL // H         # per-head dim
INV_SQRT_DK = 1.0 / math.sqrt(D_K)


# ---------------------------------------------------------------------------
# Fused Pallas kernel: fused QKV projection + attention + output projection
# ---------------------------------------------------------------------------
def _mha_fused_kernel(x_ref, wqkv_ref, bqkv_ref, wo_ref, bo_ref,
                      ret_ref, attn_ref):
    # x:    (B*S, 3*D_MODEL)  = [query | key | value] lane-concatenated
    # wqkv: (3*D_MODEL, 3*D_MODEL) block-diagonal;  bqkv: (1, 3*D_MODEL)
    # wo:   (D_MODEL, D_MODEL) (in, out);           bo:   (1, D_MODEL)
    # ret:  (B*S, D_MODEL);    attn: (B, H, S, S)
    B, NH, S, _ = attn_ref.shape

    # --- Fused Q/K/V projection: one MXU pass on a lane-dense 96-wide result.
    # TODO(synk): cast operands to bf16 (f32 accumulate) for production shapes.
    qkv = (jnp.dot(x_ref[...], wqkv_ref[...],
                   preferred_element_type=jnp.float32)
           + bqkv_ref[...])                                    # (B*S, 3*D_MODEL)

    head_scores = []
    acc = None
    for h in range(NH):                                        # H=4, unrolled
        qc = h * D_K
        kc = D_MODEL + h * D_K
        vc = 2 * D_MODEL + h * D_K
        q_h = qkv[:, qc:qc + D_K].reshape(B, S, D_K)           # (B, S, D_K)
        k_h = qkv[:, kc:kc + D_K].reshape(B, S, D_K)
        v_h = qkv[:, vc:vc + D_K].reshape(B, S, D_K)

        # One dot_general per head, batched over batch (not per (b, h)).
        s_h = jnp.einsum('bqd,bkd->bqk', q_h, k_h,
                         preferred_element_type=jnp.float32) * INV_SQRT_DK
        head_scores.append(s_h)                                # raw scaled scores

        # Softmax over keys, f32. Exact reciprocal keeps 1e-4 parity with the
        # f32 module (approx=True would push it to EUP but adds ~1e-4 error).
        m = jnp.max(s_h, axis=-1, keepdims=True)
        p = jnp.exp(s_h - m)
        p = p * pl.reciprocal(jnp.sum(p, axis=-1, keepdims=True))
        # TODO(synk): dropout(p=0.1) on p_attn is identity in eval mode; omitted.

        ctx_h = jnp.einsum('bqk,bkd->bqd', p, v_h,
                           preferred_element_type=jnp.float32)  # (B, S, D_K)

        # Fold output projection per head: accumulate into a resident f32
        # value instead of lane-axis concatenation of 8-wide head slices.
        contrib = jnp.dot(ctx_h.reshape(B * S, D_K),
                          wo_ref[qc:qc + D_K, :],
                          preferred_element_type=jnp.float32)   # (B*S, D_MODEL)
        acc = contrib if acc is None else acc + contrib

    # Single full-slab store of the raw scaled pre-softmax scores
    # (== self.attn on the PyTorch default path), replacing 16 masked stores.
    attn_ref[...] = jnp.stack(head_scores, axis=1)              # (B, H, S, S)

    # --- Output projection bias (projection itself already accumulated).
    ret_ref[...] = acc + bo_ref[...]


def multi_headed_attention(params, query, key, value):
    """query/key/value: (B, S, D_MODEL) -> (ret (B, S, D_MODEL), attn (B, H, S, S))."""
    B, S, _ = query.shape
    # Lane-concatenate the three inputs once in the wrapper (layout plumbing,
    # enables the single fused block-diagonal QKV matmul in the kernel).
    x_cat = jnp.concatenate(
        [query.reshape(B * S, D_MODEL),
         key.reshape(B * S, D_MODEL),
         value.reshape(B * S, D_MODEL)], axis=-1)               # (B*S, 3*D_MODEL)

    vmem = pl.BlockSpec(memory_space=pltpu.MemorySpace.VMEM)
    ret2d, attn = pl.pallas_call(
        _mha_fused_kernel,
        in_specs=[vmem] * 5,
        out_specs=(pl.BlockSpec(memory_space=pltpu.MemorySpace.VMEM),
                   pl.BlockSpec(memory_space=pltpu.MemorySpace.VMEM)),
        out_shape=(
            jax.ShapeDtypeStruct((B * S, D_MODEL), jnp.float32),
            jax.ShapeDtypeStruct((B, H, S, S), jnp.float32),
        ),
    )(x_cat, params["w_qkv"], params["b_qkv"], params["wo"], params["bo"])
    return ret2d.reshape(B, S, D_MODEL), attn


# ---------------------------------------------------------------------------
# Params (nn.Linear weights pre-transposed to (in, out); fused QKV built once)
# ---------------------------------------------------------------------------
def init_params(key):
    ks = jax.random.split(key, 8)
    scale = 1.0 / math.sqrt(D_MODEL)

    def lin(kw, kb):
        # nn.Linear stores W as (out, in); pre-transpose once at init.
        w_oi = jax.random.uniform(kw, (D_MODEL, D_MODEL), jnp.float32, -scale, scale)
        b = jax.random.uniform(kb, (D_MODEL,), jnp.float32, -scale, scale)
        return w_oi.T, b.reshape(1, D_MODEL)

    wq, bq = lin(ks[0], ks[1])
    wk, bk = lin(ks[2], ks[3])
    wv, bv = lin(ks[4], ks[5])
    wo, bo = lin(ks[6], ks[7])

    # Block-diagonal fused QKV weight: [xq|xk|xv] @ w_qkv == [xq@wq|xk@wk|xv@wv]
    # (exact in f32 — off-diagonal zeros contribute nothing).
    w_qkv = jnp.zeros((3 * D_MODEL, 3 * D_MODEL), jnp.float32)
    w_qkv = w_qkv.at[0 * D_MODEL:1 * D_MODEL, 0 * D_MODEL:1 * D_MODEL].set(wq)
    w_qkv = w_qkv.at[1 * D_MODEL:2 * D_MODEL, 1 * D_MODEL:2 * D_MODEL].set(wk)
    w_qkv = w_qkv.at[2 * D_MODEL:3 * D_MODEL, 2 * D_MODEL:3 * D_MODEL].set(wv)
    b_qkv = jnp.concatenate([bq, bk, bv], axis=-1)              # (1, 3*D_MODEL)

    # NOTE: the PyTorch module also owns self.weight (111x111), self.norm
    # (LayerNorm(110)) and self.dropout; none touch the default forward path,
    # so they are intentionally not materialized here.
    return dict(wq=wq, bq=bq, wk=wk, bk=bk, wv=wv, bv=bv, wo=wo, bo=bo,
                w_qkv=w_qkv, b_qkv=b_qkv)


# ---------------------------------------------------------------------------
# Pure-JAX reference (for correctness checking only)
# ---------------------------------------------------------------------------
def reference(params, query, key, value):
    B, S, _ = query.shape

    def lin(x, w_io, b):
        return x @ w_io + b

    def split_heads(x):
        return x.reshape(B, S, H, D_K).transpose(0, 2, 1, 3)

    q = split_heads(lin(query, params["wq"], params["bq"]))
    k = split_heads(lin(key, params["wk"], params["bk"]))
    v = split_heads(lin(value, params["wv"], params["bv"]))
    scores = jnp.einsum("bhqd,bhkd->bhqk", q, k) / math.sqrt(D_K)
    p = jax.nn.softmax(scores, axis=-1)
    x = jnp.einsum("bhqk,bhkd->bhqd", p, v)
    x = x.transpose(0, 2, 1, 3).reshape(B, S, D_MODEL)
    ret = lin(x, params["wo"], params["bo"])
    return ret, scores


if __name__ == "__main__":
    B, S = 2, 8
    root = jax.random.PRNGKey(0)
    kp, kq, kk, kv = jax.random.split(root, 4)

    params = init_params(kp)
    query = jax.random.normal(kq, (B, S, D_MODEL), jnp.float32)
    key = jax.random.normal(kk, (B, S, D_MODEL), jnp.float32)
    value = jax.random.normal(kv, (B, S, D_MODEL), jnp.float32)

    ret, attn = multi_headed_attention(params, query, key, value)
    ret = jax.block_until_ready(ret)
    attn = jax.block_until_ready(attn)

    ret_ref, attn_ref = reference(params, query, key, value)
    assert ret.shape == (B, S, D_MODEL) and attn.shape == (B, H, S, S)
    assert jnp.allclose(ret, ret_ref, atol=1e-4, rtol=1e-4)
    assert jnp.allclose(attn, attn_ref, atol=1e-4, rtol=1e-4)

    print("KERNEL_OK")
</pallas_src>

<mosaic_0001>
module attributes {stable_mosaic.version = 11 : i64} {
  func.func @_mha_fused_kernel(%arg0: memref<16x96xf32, #tpu.memory_space<vmem>>, %arg1: memref<96x96xf32, #tpu.memory_space<vmem>>, %arg2: memref<1x96xf32, #tpu.memory_space<vmem>>, %arg3: memref<32x32xf32, #tpu.memory_space<vmem>>, %arg4: memref<1x32xf32, #tpu.memory_space<vmem>>, %arg5: memref<16x32xf32, #tpu.memory_space<vmem>>, %arg6: memref<2x4x8x8xf32, #tpu.memory_space<vmem>>) attributes {dimension_semantics = [], scalar_prefetch = 0 : i64, scratch_operands = 0 : i64, tpu.core_type = #tpu.core_type<tc>} {
    %c0 = arith.constant 0 : index
    %c0_0 = arith.constant 0 : index
    %0 = vector.load %arg0[%c0, %c0_0] : memref<16x96xf32, #tpu.memory_space<vmem>>, vector<16x96xf32>
    %c0_1 = arith.constant 0 : index
    %c0_2 = arith.constant 0 : index
    %1 = vector.load %arg1[%c0_1, %c0_2] : memref<96x96xf32, #tpu.memory_space<vmem>>, vector<96x96xf32>
    %cst = arith.constant dense<0.000000e+00> : vector<16x96xf32>
    %2 = tpu.matmul %0, %1, %cst {dimension_numbers = #tpu.dot_dimension_numbers<[1], [0], [0], [1], [0, 0, 1, 1], [], []>} : vector<16x96xf32>, vector<96x96xf32>, vector<16x96xf32> -> vector<16x96xf32>
    %c0_3 = arith.constant 0 : index
    %c0_4 = arith.constant 0 : index
    %3 = vector.load %arg2[%c0_3, %c0_4] : memref<1x96xf32, #tpu.memory_space<vmem>>, vector<1x96xf32>
    %4 = vector.broadcast %3 : vector<1x96xf32> to vector<16x96xf32>
    %5 = arith.addf %2, %4 : vector<16x96xf32>
    %6 = vector.extract_strided_slice %5 {offsets = [0, 0], sizes = [16, 8], strides = [1, 1]} : vector<16x96xf32> to vector<16x8xf32>
    %7 = vector.shape_cast %6 : vector<16x8xf32> to vector<2x8x8xf32>
    %8 = vector.extract_strided_slice %5 {offsets = [0, 32], sizes = [16, 8], strides = [1, 1]} : vector<16x96xf32> to vector<16x8xf32>
    %9 = vector.shape_cast %8 : vector<16x8xf32> to vector<2x8x8xf32>
    %10 = vector.extract_strided_slice %5 {offsets = [0, 64], sizes = [16, 8], strides = [1, 1]} : vector<16x96xf32> to vector<16x8xf32>
    %11 = vector.shape_cast %10 : vector<16x8xf32> to vector<2x8x8xf32>
    "tpu.trace_start"() <{level = 10 : i32, message = "bqd,bkd->bqk"}> : () -> ()
    %cst_5 = arith.constant dense<0.000000e+00> : vector<2x8x8xf32>
    %12 = tpu.matmul %7, %9, %cst_5 {dimension_numbers = #tpu.dot_dimension_numbers<[2], [2], [1], [1], [0, 0, 0, 1, 1, 1], [0], [0]>} : vector<2x8x8xf32>, vector<2x8x8xf32>, vector<2x8x8xf32> -> vector<2x8x8xf32>
    "tpu.trace_stop"() : () -> ()
    %cst_6 = arith.constant 0.353553385 : f32
    %13 = vector.broadcast %cst_6 : f32 to vector<2x8x8xf32>
    %14 = arith.mulf %12, %13 : vector<2x8x8xf32>
    %cst_7 = arith.constant dense<0xFF800000> : vector<2x8xf32>
    %15 = vector.multi_reduction <maximumf>, %14, %cst_7 [2] : vector<2x8x8xf32> to vector<2x8xf32>
    %16 = vector.shape_cast %15 : vector<2x8xf32> to vector<2x8x1xf32>
    %17 = vector.broadcast %16 : vector<2x8x1xf32> to vector<2x8x8xf32>
    %18 = arith.subf %14, %17 : vector<2x8x8xf32>
    %19 = math.exp %18 : vector<2x8x8xf32>
    %cst_8 = arith.constant dense<0.000000e+00> : vector<2x8xf32>
    %20 = vector.multi_reduction <add>, %19, %cst_8 [2] : vector<2x8x8xf32> to vector<2x8xf32>
    %21 = vector.shape_cast %20 : vector<2x8xf32> to vector<2x8x1xf32>
    %22 = tpu.reciprocal %21 : vector<2x8x1xf32> -> vector<2x8x1xf32>
    %23 = vector.broadcast %22 : vector<2x8x1xf32> to vector<2x8x8xf32>
    %24 = arith.mulf %19, %23 : vector<2x8x8xf32>
    "tpu.trace_start"() <{level = 10 : i32, message = "bqk,bkd->bqd"}> : () -> ()
    %cst_9 = arith.constant dense<0.000000e+00> : vector<2x8x8xf32>
    %25 = tpu.matmul %24, %11, %cst_9 {dimension_numbers = #tpu.dot_dimension_numbers<[2], [1], [1], [2], [0, 0, 0, 1, 1, 2], [0], [0]>} : vector<2x8x8xf32>, vector<2x8x8xf32>, vector<2x8x8xf32> -> vector<2x8x8xf32>
    "tpu.trace_stop"() : () -> ()
    %26 = vector.shape_cast %25 : vector<2x8x8xf32> to vector<16x8xf32>
    %c0_10 = arith.constant 0 : index
    %c0_11 = arith.constant 0 : index
    %27 = vector.load %arg3[%c0_10, %c0_11] : memref<32x32xf32, #tpu.memory_space<vmem>>, vector<8x32xf32>
    %cst_12 = arith.constant dense<0.000000e+00> : vector<16x32xf32>
    %28 = tpu.matmul %26, %27, %cst_12 {dimension_numbers = #tpu.dot_dimension_numbers<[1], [0], [0], [1], [0, 0, 1, 1], [], []>} : vector<16x8xf32>, vector<8x32xf32>, vector<16x32xf32> -> vector<16x32xf32>
    %29 = vector.extract_strided_slice %5 {offsets = [0, 8], sizes = [16, 8], strides = [1, 1]} : vector<16x96xf32> to vector<16x8xf32>
    %30 = vector.shape_cast %29 : vector<16x8xf32> to vector<2x8x8xf32>
    %31 = vector.extract_strided_slice %5 {offsets = [0, 40], sizes = [16, 8], strides = [1, 1]} : vector<16x96xf32> to vector<16x8xf32>
    %32 = vector.shape_cast %31 : vector<16x8xf32> to vector<2x8x8xf32>
    %33 = vector.extract_strided_slice %5 {offsets = [0, 72], sizes = [16, 8], strides = [1, 1]} : vector<16x96xf32> to vector<16x8xf32>
    %34 = vector.shape_cast %33 : vector<16x8xf32> to vector<2x8x8xf32>
    "tpu.trace_start"() <{level = 10 : i32, message = "bqd,bkd->bqk"}> : () -> ()
    %cst_13 = arith.constant dense<0.000000e+00> : vector<2x8x8xf32>
    %35 = tpu.matmul %30, %32, %cst_13 {dimension_numbers = #tpu.dot_dimension_numbers<[2], [2], [1], [1], [0, 0, 0, 1, 1, 1], [0], [0]>} : vector<2x8x8xf32>, vector<2x8x8xf32>, vector<2x8x8xf32> -> vector<2x8x8xf32>
    "tpu.trace_stop"() : () -> ()
    %cst_14 = arith.constant 0.353553385 : f32
    %36 = vector.broadcast %cst_14 : f32 to vector<2x8x8xf32>
    %37 = arith.mulf %35, %36 : vector<2x8x8xf32>
    %cst_15 = arith.constant dense<0xFF800000> : vector<2x8xf32>
    %38 = vector.multi_reduction <maximumf>, %37, %cst_15 [2] : vector<2x8x8xf32> to vector<2x8xf32>
    %39 = vector.shape_cast %38 : vector<2x8xf32> to vector<2x8x1xf32>
    %40 = vector.broadcast %39 : vector<2x8x1xf32> to vector<2x8x8xf32>
    %41 = arith.subf %37, %40 : vector<2x8x8xf32>
    %42 = math.exp %41 : vector<2x8x8xf32>
    %cst_16 = arith.constant dense<0.000000e+00> : vector<2x8xf32>
    %43 = vector.multi_reduction <add>, %42, %cst_16 [2] : vector<2x8x8xf32> to vector<2x8xf32>
    %44 = vector.shape_cast %43 : vector<2x8xf32> to vector<2x8x1xf32>
    %45 = tpu.reciprocal %44 : vector<2x8x1xf32> -> vector<2x8x1xf32>
    %46 = vector.broadcast %45 : vector<2x8x1xf32> to vector<2x8x8xf32>
    %47 = arith.mulf %42, %46 : vector<2x8x8xf32>
    "tpu.trace_start"() <{level = 10 : i32, message = "bqk,bkd->bqd"}> : () -> ()
    %cst_17 = arith.constant dense<0.000000e+00> : vector<2x8x8xf32>
    %48 = tpu.matmul %47, %34, %cst_17 {dimension_numbers = #tpu.dot_dimension_numbers<[2], [1], [1], [2], [0, 0, 0, 1, 1, 2], [0], [0]>} : vector<2x8x8xf32>, vector<2x8x8xf32>, vector<2x8x8xf32> -> vector<2x8x8xf32>
    "tpu.trace_stop"() : () -> ()
    %49 = vector.shape_cast %48 : vector<2x8x8xf32> to vector<16x8xf32>
    %c8 = arith.constant 8 : index
    %c0_18 = arith.constant 0 : index
    %50 = vector.load %arg3[%c8, %c0_18] : memref<32x32xf32, #tpu.memory_space<vmem>>, vector<8x32xf32>
    %cst_19 = arith.constant dense<0.000000e+00> : vector<16x32xf32>
    %51 = tpu.matmul %49, %50, %cst_19 {dimension_numbers = #tpu.dot_dimension_numbers<[1], [0], [0], [1], [0, 0, 1, 1], [], []>} : vector<16x8xf32>, vector<8x32xf32>, vector<16x32xf32> -> vector<16x32xf32>
    %52 = arith.addf %28, %51 : vector<16x32xf32>
    %53 = vector.extract_strided_slice %5 {offsets = [0, 16], sizes = [16, 8], strides = [1, 1]} : vector<16x96xf32> to vector<16x8xf32>
    %54 = vector.shape_cast %53 : vector<16x8xf32> to vector<2x8x8xf32>
    %55 = vector.extract_strided_slice %5 {offsets = [0, 48], sizes = [16, 8], strides = [1, 1]} : vector<16x96xf32> to vector<16x8xf32>
    %56 = vector.shape_cast %55 : vector<16x8xf32> to vector<2x8x8xf32>
    %57 = vector.extract_strided_slice %5 {offsets = [0, 80], sizes = [16, 8], strides = [1, 1]} : vector<16x96xf32> to vector<16x8xf32>
    %58 = vector.shape_cast %57 : vector<16x8xf32> to vector<2x8x8xf32>
    "tpu.trace_start"() <{level = 10 : i32, message = "bqd,bkd->bqk"}> : () -> ()
    %cst_20 = arith.constant dense<0.000000e+00> : vector<2x8x8xf32>
    %59 = tpu.matmul %54, %56, %cst_20 {dimension_numbers = #tpu.dot_dimension_numbers<[2], [2], [1], [1], [0, 0, 0, 1, 1, 1], [0], [0]>} : vector<2x8x8xf32>, vector<2x8x8xf32>, vector<2x8x8xf32> -> vector<2x8x8xf32>
    "tpu.trace_stop"() : () -> ()
    %cst_21 = arith.constant 0.353553385 : f32
    %60 = vector.broadcast %cst_21 : f32 to vector<2x8x8xf32>
    %61 = arith.mulf %59, %60 : vector<2x8x8xf32>
    %cst_22 = arith.constant dense<0xFF800000> : vector<2x8xf32>
    %62 = vector.multi_reduction <maximumf>, %61, %cst_22 [2] : vector<2x8x8xf32> to vector<2x8xf32>
    %63 = vector.shape_cast %62 : vector<2x8xf32> to vector<2x8x1xf32>
    %64 = vector.broadcast %63 : vector<2x8x1xf32> to vector<2x8x8xf32>
    %65 = arith.subf %61, %64 : vector<2x8x8xf32>
    %66 = math.exp %65 : vector<2x8x8xf32>
    %cst_23 = arith.constant dense<0.000000e+00> : vector<2x8xf32>
    %67 = vector.multi_reduction <add>, %66, %cst_23 [2] : vector<2x8x8xf32> to vector<2x8xf32>
    %68 = vector.shape_cast %67 : vector<2x8xf32> to vector<2x8x1xf32>
    %69 = tpu.reciprocal %68 : vector<2x8x1xf32> -> vector<2x8x1xf32>
    %70 = vector.broadcast %69 : vector<2x8x1xf32> to vector<2x8x8xf32>
    %71 = arith.mulf %66, %70 : vector<2x8x8xf32>
    "tpu.trace_start"() <{level = 10 : i32, message = "bqk,bkd->bqd"}> : () -> ()
    %cst_24 = arith.constant dense<0.000000e+00> : vector<2x8x8xf32>
    %72 = tpu.matmul %71, %58, %cst_24 {dimension_numbers = #tpu.dot_dimension_numbers<[2], [1], [1], [2], [0, 0, 0, 1, 1, 2], [0], [0]>} : vector<2x8x8xf32>, vector<2x8x8xf32>, vector<2x8x8xf32> -> vector<2x8x8xf32>
    "tpu.trace_stop"() : () -> ()
    %73 = vector.shape_cast %72 : vector<2x8x8xf32> to vector<16x8xf32>
    %c16 = arith.constant 16 : index
    %c0_25 = arith.constant 0 : index
    %74 = vector.load %arg3[%c16, %c0_25] : memref<32x32xf32, #tpu.memory_space<vmem>>, vector<8x32xf32>
    %cst_26 = arith.constant dense<0.000000e+00> : vector<16x32xf32>
    %75 = tpu.matmul %73, %74, %cst_26 {dimension_numbers = #tpu.dot_dimension_numbers<[1], [0], [0], [1], [0, 0, 1, 1], [], []>} : vector<16x8xf32>, vector<8x32xf32>, vector<16x32xf32> -> vector<16x32xf32>
    %76 = arith.addf %52, %75 : vector<16x32xf32>
    %77 = vector.extract_strided_slice %5 {offsets = [0, 24], sizes = [16, 8], strides = [1, 1]} : vector<16x96xf32> to vector<16x8xf32>
    %78 = vector.shape_cast %77 : vector<16x8xf32> to vector<2x8x8xf32>
    %79 = vector.extract_strided_slice %5 {offsets = [0, 56], sizes = [16, 8], strides = [1, 1]} : vector<16x96xf32> to vector<16x8xf32>
    %80 = vector.shape_cast %79 : vector<16x8xf32> to vector<2x8x8xf32>
    %81 = vector.extract_strided_slice %5 {offsets = [0, 88], sizes = [16, 8], strides = [1, 1]} : vector<16x96xf32> to vector<16x8xf32>
    %82 = vector.shape_cast %81 : vector<16x8xf32> to vector<2x8x8xf32>
    "tpu.trace_start"() <{level = 10 : i32, message = "bqd,bkd->bqk"}> : () -> ()
    %cst_27 = arith.constant dense<0.000000e+00> : vector<2x8x8xf32>
    %83 = tpu.matmul %78, %80, %cst_27 {dimension_numbers = #tpu.dot_dimension_numbers<[2], [2], [1], [1], [0, 0, 0, 1, 1, 1], [0], [0]>} : vector<2x8x8xf32>, vector<2x8x8xf32>, vector<2x8x8xf32> -> vector<2x8x8xf32>
    "tpu.trace_stop"() : () -> ()
    %cst_28 = arith.constant 0.353553385 : f32
    %84 = vector.broadcast %cst_28 : f32 to vector<2x8x8xf32>
    %85 = arith.mulf %83, %84 : vector<2x8x8xf32>
    %cst_29 = arith.constant dense<0xFF800000> : vector<2x8xf32>
    %86 = vector.multi_reduction <maximumf>, %85, %cst_29 [2] : vector<2x8x8xf32> to vector<2x8xf32>
    %87 = vector.shape_cast %86 : vector<2x8xf32> to vector<2x8x1xf32>
    %88 = vector.broadcast %87 : vector<2x8x1xf32> to vector<2x8x8xf32>
    %89 = arith.subf %85, %88 : vector<2x8x8xf32>
    %90 = math.exp %89 : vector<2x8x8xf32>
    %cst_30 = arith.constant dense<0.000000e+00> : vector<2x8xf32>
    %91 = vector.multi_reduction <add>, %90, %cst_30 [2] : vector<2x8x8xf32> to vector<2x8xf32>
    %92 = vector.shape_cast %91 : vector<2x8xf32> to vector<2x8x1xf32>
    %93 = tpu.reciprocal %92 : vector<2x8x1xf32> -> vector<2x8x1xf32>
    %94 = vector.broadcast %93 : vector<2x8x1xf32> to vector<2x8x8xf32>
    %95 = arith.mulf %90, %94 : vector<2x8x8xf32>
    "tpu.trace_start"() <{level = 10 : i32, message = "bqk,bkd->bqd"}> : () -> ()
    %cst_31 = arith.constant dense<0.000000e+00> : vector<2x8x8xf32>
    %96 = tpu.matmul %95, %82, %cst_31 {dimension_numbers = #tpu.dot_dimension_numbers<[2], [1], [1], [2], [0, 0, 0, 1, 1, 2], [0], [0]>} : vector<2x8x8xf32>, vector<2x8x8xf32>, vector<2x8x8xf32> -> vector<2x8x8xf32>
    "tpu.trace_stop"() : () -> ()
    %97 = vector.shape_cast %96 : vector<2x8x8xf32> to vector<16x8xf32>
    %c24 = arith.constant 24 : index
    %c0_32 = arith.constant 0 : index
    %98 = vector.load %arg3[%c24, %c0_32] : memref<32x32xf32, #tpu.memory_space<vmem>>, vector<8x32xf32>
    %cst_33 = arith.constant dense<0.000000e+00> : vector<16x32xf32>
    %99 = tpu.matmul %97, %98, %cst_33 {dimension_numbers = #tpu.dot_dimension_numbers<[1], [0], [0], [1], [0, 0, 1, 1], [], []>} : vector<16x8xf32>, vector<8x32xf32>, vector<16x32xf32> -> vector<16x32xf32>
    %100 = arith.addf %76, %99 : vector<16x32xf32>
    %101 = vector.shape_cast %14 : vector<2x8x8xf32> to vector<2x1x8x8xf32>
    %102 = vector.shape_cast %37 : vector<2x8x8xf32> to vector<2x1x8x8xf32>
    %103 = vector.shape_cast %61 : vector<2x8x8xf32> to vector<2x1x8x8xf32>
    %104 = vector.shape_cast %85 : vector<2x8x8xf32> to vector<2x1x8x8xf32>
    %105 = tpu.concatenate %101, %102, %103, %104 in 1 : vector<2x1x8x8xf32>, vector<2x1x8x8xf32>, vector<2x1x8x8xf32>, vector<2x1x8x8xf32> -> vector<2x4x8x8xf32>
    %c0_34 = arith.constant 0 : index
    %c0_35 = arith.constant 0 : index
    %c0_36 = arith.constant 0 : index
    %c0_37 = arith.constant 0 : index
    %106 = vector.load %arg6[%c0_34, %c0_35, %c0_36, %c0_37] : memref<2x4x8x8xf32, #tpu.memory_space<vmem>>, vector<2x4x8x8xf32>
    tpu.vector_store %arg6[%c0_34, %c0_35, %c0_36, %c0_37], %105 {strides = array<i32>} : memref<2x4x8x8xf32, #tpu.memory_space<vmem>>, vector<2x4x8x8xf32>,
    %c0_38 = arith.constant 0 : index
    %c0_39 = arith.constant 0 : index
    %107 = vector.load %arg4[%c0_38, %c0_39] : memref<1x32xf32, #tpu.memory_space<vmem>>, vector<1x32xf32>
    %108 = vector.broadcast %107 : vector<1x32xf32> to vector<16x32xf32>
    %109 = arith.addf %100, %108 : vector<16x32xf32>
    %c0_40 = arith.constant 0 : index
    %c0_41 = arith.constant 0 : index
    %110 = vector.load %arg5[%c0_40, %c0_41] : memref<16x32xf32, #tpu.memory_space<vmem>>, vector<16x32xf32>
    tpu.vector_store %arg5[%c0_40, %c0_41], %109 {strides = array<i32>} : memref<16x32xf32, #tpu.memory_space<vmem>>, vector<16x32xf32>,
    return
  }
}

</mosaic_0001>

<bundles_post_ra>
// kernel: tpu_custom_call.1
= control target key start
LH: loop header
LB: loop body
LE: loop exit
PB: predicated region body
PF: predicated region fallthrough
CT: control target
= control target key end

     0   :  { %12 = vsyncpa [#allocation3], 0  ;;  %s1357_s0 = inlined_call_operand.hbm [shape: f32[16,96], index: 0, kind: input, shape index: {}]   ;;  %s1358_s1 = inlined_call_operand.hbm [shape: f32[96,96], index: 1, kind: input, shape index: {}]   ;;  %s1359_s2 = inlined_call_operand.vmem [shape: f32[1,96], index: 2, kind: input, shape index: {}]   ;;  %s1360_s3 = inlined_call_operand.hbm [shape: f32[32,32], index: 3, kind: input, shape index: {}]   ;;  %s1361_s4 = inlined_call_operand.vmem [shape: f32[1,32], index: 4, kind: input, shape index: {}]   ;;  %s1362_s5 = inlined_call_operand.hbm [shape: f32[16,32], index: 5, kind: output, shape index: {0}]   ;;  %s1363_s6 = inlined_call_operand.hbm [shape: f32[2,4,8,8], index: 6, kind: output, shape index: {1}]  }
   0x1   :  { %13 = vsyncpa [#allocation6], 0 }
   0x2   :  { %14 = vsyncpa [#allocation4], 0 }
   0x3   :  { %15 = vsyncpa [#allocation10], 0  ;;  %s33_s23 = sshll.u32 %s1358_s1, 4  ;;  %s1143_s24 = smov [#allocation5]   ;;  %s34_s23 = int_to_ptr.hbm [resolvable:$true] %s33_s23 }
   0x4   :  { %s35_s25 = sshll.u32 %s1143_s24, 4  ;;  %s20_s28 = sshll.u32 %s1357_s0, 4  ;;  %s36_s25 = int_to_ptr.vmem [resolvable:$true] %s35_s25  ;;  %s21_s28 = int_to_ptr.hbm [resolvable:$true] %s20_s28 }
   0x5   :  { %s1144_s29 = smov 128   ;;  %s1145_s30 = smov 8  }
   0x6   :  { %41 = dma.hbm_to_vmem [thread:$0]  %s34_s23, 1536, %s36_s25, [#allocation6], %s1144_s29, %s1144_s29, %s1145_s30  }
   0x7   :  { %s1146_s7 = smov [#allocation2]   ;;  %s48_s1 = sshll.u32 %s1360_s3, 4  ;;  %s49_s1 = int_to_ptr.hbm [resolvable:$true] %s48_s1 }
   0x8   :  { %s22_s8 = sshll.u32 %s1146_s7, 4  ;;  %s1147_s0 = smov [#allocation7]   ;;  %s23_s8 = int_to_ptr.vmem [resolvable:$true] %s22_s8 }
   0x9   :  { %28 = dma.hbm_to_vmem [thread:$0]  %s21_s28, 256, %s23_s8, [#allocation3], %s1144_s29, %s1144_s29, %s1145_s30  }
   0xa   :  { %s50_s11 = sshll.u32 %s1147_s0, 4  ;;  %s51_s11 = int_to_ptr.vmem [resolvable:$true] %s50_s11 }
   0xb   :  { %56 = dma.hbm_to_vmem [thread:$0]  %s49_s1, 512, %s51_s11, [#allocation6], %s1144_s29, %s1144_s29, %s1145_s30  }
   0xc   :  { %1135 = dma.done.wait [#allocation3], 256  }
   0xd   :  { %1136 = vsyncadd [#allocation3], 4294967040 }
   0xe   :  { %1137 = dma.done.wait [#allocation6], 2048  }
   0xf   :  { %1138 = vsyncadd [#allocation6], 4294965248  ;;  %v84_v0 = vld [vmem:[#allocation5 + $0x58] sm:$0xff]  ;;  %v83_v1 = vld [vmem:[#allocation5 + $0x50] sm:$0xff]  ;;  %vm89_vm0 = vcmask 785408   ;;  %s1148_s13 = smov 88  }
  0x10   :  { %100 = vmatpush.msra.mxu0 %v84_v0  ;;  %v82_v2 = vld [vmem:[#allocation5 + $0x48] sm:$0xff]  ;;  %v81_v3 = vld [vmem:[#allocation5 + $0x40] sm:$0xff]  ;;  %v80_v4 = vld [vmem:[#allocation5 + $0x38] sm:$0xff]  ;;  %s1149_s14 = smov 96   ;;  %s1150_s15 = smov 120   ;;  %vm122_vm1 = vcmask 64512  }
  0x11   :  { %v79_v5 = vld [vmem:[#allocation5 + $0x30] sm:$0xff]  ;;  %v78_v6 = vld [vmem:[#allocation5 + $0x28] sm:$0xff]  ;;  %v77_v7 = vld [vmem:[#allocation5 + $0x20] sm:$0xff]  ;;  %s1152_s16 = smov 80   ;;  %s1153_s17 = smov 112  }
  0x12   :  { %101 = vmatpush.msra.mxu0 %v83_v1  ;;  %v76_v8 = vld [vmem:[#allocation5 + $0x18] sm:$0xff]  ;;  %v75_v9 = vld [vmem:[#allocation5 + $0x10] sm:$0xff]  ;;  %v74_v10 = vld [vmem:[#allocation5 + $0x8] sm:$0xff]  ;;  %s1154_s18 = smov 64   ;;  %s1155_s19 = smov 48  }
  0x13   :  { %v73_v11 = vld [vmem:[#allocation5] sm:$0xff]  ;;  %v71_v12 = vld [vmem:[#allocation2] sm:$0xff]  ;;  %v72_v13 = vld [vmem:[#allocation2 + $0x8] sm:$0xff]  ;;  %s1156_s20 = smov 72   ;;  %s1157_s21 = smov 104  }
  0x14   :  { %102 = vmatpush.msra.mxu0 %v82_v2  ;;  %v981_v14 = vld [vmem:[%s1359_s2] ss:$0 sm:$0xff]  ;;  %s1151_s2 = smov 56   ;;  %v435_v40 = vld [vmem:[#allocation7 + $0x8] sm:$0xff]  ;;  %s1158_s22 = smov 40  }
  0x15   :  { %s1159_s25 = smov [#allocation9]   ;;  %s910_s7 = sshll.u32 %s1363_s6, 4  ;;  %s911_s7 = int_to_ptr.hbm [resolvable:$true] %s910_s7 }
  0x16   :  { %103 = vmatpush.msra.mxu0 %v81_v3  ;;  %s908_s26 = sshll.u32 %s1159_s25, 4  ;;  %s897_s6 = sshll.u32 %s1362_s5, 4  ;;  %s909_s26 = int_to_ptr.vmem [resolvable:$true] %s908_s26  ;;  %s898_s6 = int_to_ptr.hbm [resolvable:$true] %s897_s6 }
  0x18   :  { %104 = vmatpush.msra.mxu0 %v80_v4 }
  0x1a   :  { %105 = vmatpush.msra.mxu0 %v79_v5 }
  0x1c   :  { %106 = vmatpush.msra.mxu0 %v78_v6 }
  0x1e   :  { %107 = vmatpush.msra.mxu0 %v77_v7 }
  0x20   :  { %108 = vmatpush.msra.mxu0 %v76_v8 }
  0x22   :  { %109 = vmatpush.msra.mxu0 %v75_v9 }
  0x24   :  { %110 = vmatpush.msra.mxu0 %v74_v10 }
  0x26   :  { %111 = vmatpush.msra.mxu0 %v73_v11 }
  0x27   :  { %929 = vmatmul.msk.f32.vlgmr.msra.gmra.mxu0 %vm89_vm0, %v71_v12 }
  0x2f   :  { %930 = vmatmul.msk.f32.gmra.mxu0 %vm89_vm0, %v72_v13 }
  0xa4   :  { %v113_v15 = vpop.f32.mrf.mxu0 }
  0xa5   :  { %v1217_v16 = vadd.f32 %v981_v14, %v113_v15 }
  0xa7   :  { %279 = vrot.lane.b32.xlu2 %v1217_v16, %s1148_s13  ;;  %120 = vrot.lane.b32.xlu1 %v1217_v16, %s1149_s14 }
  0xac   :  { %v116_v17 = vpop.f32.mrf.mxu0 }
  0xad   :  { %v1221_v18 = vadd.f32 %v981_v14, %v116_v17 }
  0xaf   :  { %307 = vrot.lane.b32.xlu0 %v1221_v18, %s1148_s13  ;;  %277 = vrot.lane.b32.xlu2 %v1217_v16, %s1150_s15 }
  0xb0   :  { %148 = vrot.lane.b32.xlu1 %v1221_v18, %s1149_s14 }
  0xb7   :  { %305 = vrot.lane.b32.xlu0 %v1221_v18, %s1150_s15  ;;  %409 = vrot.lane.b32.xlu2 %v1221_v18, %s1151_s2 }
  0xbf   :  { %496 = vrot.lane.b32.xlu2 %v1217_v16, %s1152_s16 }
  0xc7   :  { %494 = vrot.lane.b32.xlu2 %v1217_v16, %s1153_s17 }
 0x101   :  { %v280_v19 = vpop.permute.xlu2 %279 }
 0x109   :  { %v278_v20 = vpop.permute.xlu2 %277 }
 0x111   :  { %v410_v22 = vpop.permute.xlu2 %409 }
 0x119   :  { %v121_v21 = vpop.permute.xlu1 %120  ;;  %v497_v25 = vpop.permute.xlu2 %496 }
 0x11a   :  { %931 = vmatpush.xpose.msk.msra.mxu1 %vm122_vm1, %v121_v21 }
 0x11d   :  { %932 = vmatmul.msk.f32.vlgmr.msra.gmra.mxu1 %vm122_vm1, %v1217_v16 }
 0x11e   :  { %937 = vmatpush.xpose.msk.msrb.mxu1 %vm122_vm1, %v280_v19 }
 0x121   :  { %v308_v23 = vpop.permute.xlu0 %307  ;;  %v1261_v38 = vpop.permute.xlu2 %494 }
 0x122   :  { %430 = vmatpush.msra.mxu1 %v410_v22  ;;  %v149_v24 = vpop.permute.xlu1 %148  ;;  %939 = vmatpush.xpose.msk.msra.mxu2 %vm122_vm1, %v308_v23 }
 0x123   :  { %933 = vmatpush.xpose.msk.msrb.mxu0 %vm122_vm1, %v149_v24 }
 0x125   :  { %938 = vmatmul.msk.f32.vlgmr.msrb.gmra.mxu1 %vm122_vm1, %v278_v20 }
 0x126   :  { %934 = vmatmul.msk.f32.vlgmr.msrb.gmra.mxu0 %vm122_vm1, %v1221_v18  ;;  %947 = vmatpush.xpose.msk.msrb.mxu1 %vm122_vm1, %v497_v25 }
 0x127   :  { %457 = vmatpush.msrb.mxu2 %v435_v40 }
 0x129   :  { %v306_v26 = vpop.permute.xlu0 %305 }
 0x12a   :  { %940 = vmatmul.msk.f32.vlgmr.msra.gmra.mxu2 %vm122_vm1, %v306_v26 }
 0x19a   :  { %v144_v27 = vpop.f32.mrf.mxu1 }
 0x19b   :  { %v174_v28 = vmul.f32 0.35355338, %v144_v27 }
 0x19d   :  { %874 = vst.msk [vmem:[#allocation9] sm:$0xff] %vm122_vm1, %v174_v28  ;;  %v176_v29 = vsel %vm122_vm1, %v174_v28, -inf }
 0x19e   :  { %177 = vmax.xlane.f32.xlu2 %v176_v29 }
 0x1a2   :  { %v302_v30 = vpop.f32.mrf.mxu1 }
 0x1a3   :  { %v171_v31 = vpop.f32.mrf.mxu0  ;;  %v333_v32 = vmul.f32 0.35355338, %v302_v30 }
 0x1a4   :  { %v175_v33 = vmul.f32 0.35355338, %v171_v31 }
 0x1a5   :  { %875 = vst.msk [vmem:[#allocation9 + $0x8] sm:$0xff] %vm122_vm1, %v333_v32  ;;  %v335_v57 = vsel %vm122_vm1, %v333_v32, -inf }
 0x1a6   :  { %878 = vst.msk [vmem:[#allocation9 + $0x20] sm:$0xff] %vm122_vm1, %v175_v33  ;;  %v179_v37 = vsel %vm122_vm1, %v175_v33, -inf }
 0x1ad   :  { %v330_v34 = vpop.f32.mrf.mxu2 }
 0x1ae   :  { %v334_v35 = vmul.f32 0.35355338, %v330_v34 }
 0x1b0   :  { %879 = vst.msk [vmem:[#allocation9 + $0x28] sm:$0xff] %vm122_vm1, %v334_v35  ;;  %v338_v36 = vsel %vm122_vm1, %v334_v35, -inf }
 0x1b1   :  { %339 = vmax.xlane.f32.xlu0 %v338_v36 }
 0x1b6   :  { %250 = vrot.lane.b32.xlu2 %v1221_v18, %s1154_s18 }
 0x1b9   :  { %180 = vmax.xlane.f32.xlu0 %v179_v37 }
 0x1be   :  { %524 = vrot.lane.b32.xlu2 %v1221_v18, %s1152_s16 }
 0x1c6   :  { %522 = vrot.lane.b32.xlu2 %v1221_v18, %s1153_s17 }
 0x1ce   :  { %600 = vrot.lane.b32.xlu2 %v1217_v16, %s1155_s19 }
 0x1d6   :  { %686 = vrot.lane.b32.xlu2 %v1217_v16, %s1156_s20 }
 0x1de   :  { %714 = vrot.lane.b32.xlu2 %v1221_v18, %s1156_s20 }
 0x211   :  { %v178_v39 = vpop.xlane.xlu2 %177 }
 0x212   :  { %v182_v41 = vsub.f32 %v174_v28, %v178_v39 }
 0x214   :  { %v184_v42 = vmul.f32 1.442695, %v182_v41 }
 0x216   :  { %983 = vpow2.f32 %v184_v42 }
 0x219   :  { %v1263_v43 = vpop.permute.xlu2 %250 }
 0x21c   :  { %v1265_v44 = vpop.eup %983 }
 0x21d   :  { %v188_v45 = vsel %vm122_vm1, %v1265_v44, 0.0 }
 0x21e   :  { %189 = vadd.xlane.f32.xlu0 %v188_v45 }
 0x221   :  { %v525_v46 = vpop.permute.xlu2 %524 }
 0x224   :  { %v340_v47 = vpop.xlane.xlu0 %339 }
 0x225   :  { %v342_v48 = vsub.f32 %v334_v35, %v340_v47 }
 0x227   :  { %v345_v49 = vmul.f32 1.442695, %v342_v48 }
 0x229   :  { %985 = vpow2.f32 %v345_v49  ;;  %v1269_v50 = vpop.permute.xlu2 %522 }
 0x22c   :  { %v181_v51 = vpop.xlane.xlu0 %180 }
 0x22d   :  { %v183_v53 = vsub.f32 %v175_v33, %v181_v51 }
 0x22f   :  { %v986_v52 = vpop.eup %985  ;;  %v186_v56 = vmul.f32 1.442695, %v183_v53 }
 0x230   :  { %v350_v54 = vsel %vm122_vm1, %v986_v52, 0.0 }
 0x231   :  { %351 = vadd.xlane.f32.xlu1 %v350_v54  ;;  %v601_v55 = vpop.permute.xlu2 %600  ;;  %987 = vpow2.f32 %v186_v56 }
 0x232   :  { %621 = vmatpush.msra.mxu2 %v601_v55 }
 0x237   :  { %v1273_v58 = vpop.eup %987 }
 0x238   :  { %v191_v59 = vsel %vm122_vm1, %v1273_v58, 0.0 }
 0x239   :  { %336 = vmax.xlane.f32.xlu1 %v335_v57  ;;  %v687_v23 = vpop.permute.xlu2 %686  ;;  %v276_v57 = vld [vmem:[#allocation7] sm:$0xff] }
 0x241   :  { %192 = vadd.xlane.f32.xlu1 %v191_v59 }
 0x25a   :  { %224 = vrot.lane.b32.xlu1 %v1217_v16, %s1154_s18 }
 0x291   :  { %v190_v61 = vpop.xlane.xlu0 %189 }
 0x292   :  { %v205_v26 = vand.u32 2147483648, %v190_v61  ;;  %vm199_vm7 = vweird.f32 %v190_v61  ;;  %v203_v27 = vand.u32 2147483647, %v190_v61 }
 0x294   :  { %v206_v30 = vor.u32 1.1754944e-38, %v205_v26  ;;  %vm204_vm9 = vcmp.eq.f32.partialorder %v203_v27, 8.507059e+37 }
 0x2a4   :  { %v352_v60 = vpop.xlane.xlu1 %351 }
 0x2a5   :  { %989 = vrcp.f32 %v352_v60  ;;  %v378_v3 = vand.u32 2147483648, %v352_v60  ;;  %v376_v6 = vand.u32 2147483647, %v352_v60  ;;  %vm372_vm3 = vweird.f32 %v352_v60 }
 0x2a6   :  { %991 = vrcp.f32 %v190_v61 }
 0x2a7   :  { %v379_v9 = vor.u32 1.1754944e-38, %v378_v3  ;;  %vm377_vm5 = vcmp.eq.f32.partialorder %v376_v6, 8.507059e+37 }
 0x2ab   :  { %v990_v62 = vpop.eup %989 }
 0x2ac   :  { %v368_v63 = vmul.f32 %v990_v62, %v352_v60  ;;  %v337_v0 = vpop.xlane.xlu1 %336  ;;  %vm373_vm2 = vweird.f32 %v990_v62  ;;  %v992_v8 = vpop.eup %991 }
 0x2ad   :  { %v341_v1 = vsub.f32 %v333_v32, %v337_v0  ;;  %vm374_vm4 = vmor %vm372_vm3, %vm373_vm2  ;;  %v195_v13 = vmul.f32 %v992_v8, %v190_v61  ;;  %vm200_vm6 = vweird.f32 %v992_v8  ;;  %v715_v0 = vpop.permute.xlu2 %714 }
 0x2ae   :  { %v369_v2 = vsub.f32 1.0, %v368_v63  ;;  %vm201_vm8 = vmor %vm199_vm7, %vm200_vm6 }
 0x2af   :  { %v343_v4 = vmul.f32 1.442695, %v341_v1  ;;  %v196_v19 = vsub.f32 1.0, %v195_v13 }
 0x2b0   :  { %v370_v5 = vmul.f32 %v990_v62, %v369_v2 }
 0x2b1   :  { %993 = vpow2.f32 %v343_v4  ;;  %v197_v21 = vmul.f32 %v992_v8, %v196_v19 }
 0x2b2   :  { %v371_v7 = vadd.f32 %v990_v62, %v370_v5 }
 0x2b3   :  { %v198_v25 = vadd.f32 %v992_v8, %v197_v21 }
 0x2b4   :  { %v375_v10 = vsel %vm374_vm4, %v990_v62, %v371_v7  ;;  %v193_v11 = vpop.xlane.xlu1 %192 }
 0x2b5   :  { %v380_v12 = vsel %vm377_vm5, %v379_v9, %v375_v10  ;;  %995 = vrcp.f32 %v193_v11  ;;  %v202_v29 = vsel %vm201_vm8, %v992_v8, %v198_v25  ;;  %v219_v33 = vand.u32 2147483648, %v193_v11 }
 0x2b6   :  { %v382_v14 = vmul.f32 %v986_v52, %v380_v12  ;;  %v207_v31 = vsel %vm204_vm9, %v206_v30, %v202_v29  ;;  %vm213_vm11 = vweird.f32 %v193_v11  ;;  %v217_v34 = vand.u32 2147483647, %v193_v11 }
 0x2b7   :  { %v994_v15 = vpop.eup %993  ;;  %v222_v36 = vmul.f32 %v1265_v44, %v207_v31  ;;  %v652_v31 = vld [vmem:[#allocation7 + $0x10] sm:$0xff] }
 0x2b8   :  { %942 = vmatmul.msk.f32.vlgmr.msra.gmra.mxu1 %vm122_vm1, %v382_v14  ;;  %v347_v17 = vsel %vm122_vm1, %v994_v15, 0.0  ;;  %vm218_vm13 = vcmp.eq.f32.partialorder %v217_v34, 8.507059e+37 }
 0x2b9   :  { %949 = vmatpush.xpose.msk.msra.mxu1 %vm122_vm1, %v525_v46  ;;  %348 = vadd.xlane.f32.xlu0 %v347_v17 }
 0x2bb   :  { %v996_v20 = vpop.eup %995 }
 0x2bc   :  { %v209_v22 = vmul.f32 %v996_v20, %v193_v11  ;;  %vm214_vm10 = vweird.f32 %v996_v20 }
 0x2bd   :  { %vm215_vm12 = vmor %vm213_vm11, %vm214_vm10 }
 0x2be   :  { %v210_v24 = vsub.f32 1.0, %v209_v22 }
 0x2c0   :  { %948 = vmatmul.msk.f32.vlgmr.msrb.gmra.mxu1 %vm122_vm1, %v1261_v38  ;;  %v211_v28 = vmul.f32 %v996_v20, %v210_v24  ;;  %v220_v38 = vor.u32 1.1754944e-38, %v219_v33 }
 0x2c1   :  { %955 = vmatpush.xpose.msk.msrb.mxu1 %vm122_vm1, %v687_v23 }
 0x2c2   :  { %v212_v32 = vadd.f32 %v996_v20, %v211_v28 }
 0x2c4   :  { %v216_v37 = vsel %vm215_vm12, %v996_v20, %v212_v32 }
 0x2c5   :  { %v221_v39 = vsel %vm218_vm13, %v220_v38, %v216_v37 }
 0x2c6   :  { %v223_v40 = vmul.f32 %v1273_v58, %v221_v39 }
 0x2c8   :  { %950 = vmatmul.msk.f32.vlgmr.msra.gmra.mxu1 %vm122_vm1, %v1269_v50 }
 0x2cc   :  { %v225_v35 = vpop.permute.xlu1 %224 }
 0x2cd   :  { %383 = vrot.lane.b32.xlu0 %v1217_v16, %s1151_s2  ;;  %245 = vmatpush.msra.mxu3 %v225_v35 }
 0x2ce   :  { %935 = vmatmul.msk.f32.vlgmr.msra.gmra.mxu3 %vm122_vm1, %v222_v36 }
 0x2cf   :  { %271 = vmatpush.msrb.mxu3 %v1263_v43 }
 0x2d6   :  { %936 = vmatmul.msk.f32.vlgmr.msrb.gmra.mxu3 %vm122_vm1, %v223_v40 }
 0x32c   :  { %v349_v41 = vpop.xlane.xlu0 %348 }
 0x32d   :  { %997 = vrcp.f32 %v349_v41  ;;  %v364_v47 = vand.u32 2147483648, %v349_v41  ;;  %v362_v49 = vand.u32 2147483647, %v349_v41  ;;  %vm358_vm15 = vweird.f32 %v349_v41 }
 0x32f   :  { %v365_v43 = vor.u32 1.1754944e-38, %v364_v47  ;;  %vm363_vm2 = vcmp.eq.f32.partialorder %v362_v49, 8.507059e+37 }
 0x333   :  { %v998_v42 = vpop.eup %997 }
 0x334   :  { %v354_v44 = vmul.f32 %v998_v42, %v349_v41  ;;  %vm359_vm14 = vweird.f32 %v998_v42 }
 0x335   :  { %v432_v45 = vpop.f32.mrf.mxu1  ;;  %vm360_vm0 = vmor %vm358_vm15, %vm359_vm14 }
 0x336   :  { %v355_v46 = vsub.f32 1.0, %v354_v44 }
 0x338   :  { %v356_v48 = vmul.f32 %v998_v42, %v355_v46 }
 0x33a   :  { %v357_v50 = vadd.f32 %v998_v42, %v356_v48 }
 0x33c   :  { %v361_v51 = vsel %vm360_vm0, %v998_v42, %v357_v50 }
 0x33d   :  { %v366_v52 = vsel %vm363_vm2, %v365_v43, %v361_v51  ;;  %v519_v53 = vpop.f32.mrf.mxu1 }
 0x33e   :  { %v550_v54 = vmul.f32 0.35355338, %v519_v53  ;;  %v381_v55 = vmul.f32 %v994_v15, %v366_v52 }
 0x33f   :  { %v384_v56 = vpop.permute.xlu0 %383 }
 0x340   :  { %876 = vst.msk [vmem:[#allocation9 + $0x10] sm:$0xff] %vm122_vm1, %v550_v54  ;;  %404 = vmatpush.msra.mxu3 %v384_v56  ;;  %v552_v58 = vsel %vm122_vm1, %v550_v54, -inf }
 0x341   :  { %553 = vmax.xlane.f32.xlu1 %v552_v58  ;;  %941 = vmatmul.msk.f32.vlgmr.msra.gmra.mxu3 %vm122_vm1, %v381_v55 }
 0x342   :  { %486 = vmatpush.msrb.mxu3 %v276_v57 }
 0x344   :  { %674 = vmatpush.msra.mxu3 %v652_v31 }
 0x345   :  { %v547_v59 = vpop.f32.mrf.mxu1 }
 0x346   :  { %v551_v60 = vmul.f32 0.35355338, %v547_v59 }
 0x348   :  { %880 = vst.msk [vmem:[#allocation9 + $0x30] sm:$0xff] %vm122_vm1, %v551_v60  ;;  %v555_v61 = vsel %vm122_vm1, %v551_v60, -inf }
 0x349   :  { %556 = vmax.xlane.f32.xlu2 %v555_v61 }
 0x351   :  { %v247_v62 = vpop.f32.mrf.mxu3 }
 0x352   :  { %945 = vmatmul.msk.f32.vlgmr.msrb.gmra.mxu3 %vm122_vm1, %v247_v62 }
 0x359   :  { %v273_v63 = vpop.f32.mrf.mxu3 }
 0x35a   :  { %684 = vrot.lane.b32.xlu1 %v1217_v16, %s1157_s21  ;;  %946 = vmatmul.msk.f32.gmra.mxu3 %vm122_vm1, %v273_v63 }
 0x3b4   :  { %v554_v1 = vpop.xlane.xlu1 %553 }
 0x3b5   :  { %v558_v2 = vsub.f32 %v550_v54, %v554_v1 }
 0x3b7   :  { %v560_v3 = vmul.f32 1.442695, %v558_v2 }
 0x3b9   :  { %999 = vpow2.f32 %v560_v3 }
 0x3bc   :  { %v557_v4 = vpop.xlane.xlu2 %556 }
 0x3bd   :  { %v559_v5 = vsub.f32 %v551_v60, %v557_v4 }
 0x3bf   :  { %v1000_v6 = vpop.eup %999  ;;  %v562_v7 = vmul.f32 1.442695, %v559_v5 }
 0x3c0   :  { %v564_v8 = vsel %vm122_vm1, %v1000_v6, 0.0 }
 0x3c1   :  { %1001 = vpow2.f32 %v562_v7  ;;  %565 = vadd.xlane.f32.xlu0 %v564_v8 }
 0x3c4   :  { %v406_v9 = vpop.f32.mrf.mxu3 }
 0x3c5   :  { %943 = vmatmul.msk.f32.vlgmr.msrb.gmra.mxu2 %vm122_vm1, %v406_v9 }
 0x3c6   :  { %957 = vmatpush.xpose.msk.msrb.mxu2 %vm122_vm1, %v715_v0 }
 0x3c7   :  { %v1305_v10 = vpop.eup %1001 }
 0x3c8   :  { %v567_v11 = vsel %vm122_vm1, %v1305_v10, 0.0 }
 0x3c9   :  { %568 = vadd.xlane.f32.xlu2 %v567_v11 }
 0x3cc   :  { %v685_v12 = vpop.permute.xlu1 %684 }
 0x3cd   :  { %944 = vmatmul.msk.f32.gmra.mxu2 %vm122_vm1, %v432_v45  ;;  %956 = vmatmul.msk.f32.vlgmr.msrb.gmra.mxu1 %vm122_vm1, %v685_v12 }
 0x3d5   :  { %712 = vrot.lane.b32.xlu0 %v1221_v18, %s1157_s21 }
 0x434   :  { %v566_v13 = vpop.xlane.xlu0 %565 }
 0x435   :  { %1003 = vrcp.f32 %v566_v13  ;;  %v581_v19 = vand.u32 2147483648, %v566_v13  ;;  %v579_v21 = vand.u32 2147483647, %v566_v13  ;;  %vm575_vm4 = vweird.f32 %v566_v13 }
 0x437   :  { %v582_v23 = vor.u32 1.1754944e-38, %v581_v19  ;;  %vm580_vm6 = vcmp.eq.f32.partialorder %v579_v21, 8.507059e+37 }
 0x43b   :  { %v1004_v14 = vpop.eup %1003 }
 0x43c   :  { %v571_v15 = vmul.f32 %v1004_v14, %v566_v13  ;;  %vm576_vm3 = vweird.f32 %v1004_v14  ;;  %v569_v32 = vpop.xlane.xlu2 %568 }
 0x43d   :  { %vm577_vm5 = vmor %vm575_vm4, %vm576_vm3  ;;  %1005 = vrcp.f32 %v569_v32  ;;  %v595_v44 = vand.u32 2147483648, %v569_v32  ;;  %vm589_vm8 = vweird.f32 %v569_v32  ;;  %v593_v47 = vand.u32 2147483647, %v569_v32 }
 0x43e   :  { %v572_v17 = vsub.f32 1.0, %v571_v15  ;;  %vm888_vm4 = vcmask 261120  }
 0x43f   :  { %v596_v50 = vor.u32 1.1754944e-38, %v595_v44  ;;  %vm594_vm10 = vcmp.eq.f32.partialorder %v593_v47, 8.507059e+37 }
 0x440   :  { %v573_v20 = vmul.f32 %v1004_v14, %v572_v17 }
 0x442   :  { %v574_v22 = vadd.f32 %v1004_v14, %v573_v20 }
 0x443   :  { %v1006_v34 = vpop.eup %1005 }
 0x444   :  { %v578_v24 = vsel %vm577_vm5, %v1004_v14, %v574_v22  ;;  %v585_v35 = vmul.f32 %v1006_v34, %v569_v32  ;;  %vm590_vm7 = vweird.f32 %v1006_v34  ;;  %v982_v32 = vld [vmem:[%s1361_s4] ss:$0 sm:$0xff]  ;;  %s1160_s4 = smov [#allocation8]  }
 0x445   :  { %v583_v25 = vsel %vm580_vm6, %v582_v23, %v578_v24  ;;  %vm591_vm9 = vmor %vm589_vm8, %vm590_vm7  ;;  %s895_s8 = sshll.u32 %s1160_s4, 4  ;;  %s896_s8 = int_to_ptr.vmem [resolvable:$true] %s895_s8 }
 0x446   :  { %v598_v26 = vmul.f32 %v1000_v6, %v583_v25  ;;  %v586_v37 = vsub.f32 1.0, %v585_v35 }
 0x447   :  { %v713_v30 = vpop.permute.xlu0 %712 }
 0x448   :  { %951 = vmatmul.msk.f32.vlgmr.msra.gmra.mxu2 %vm122_vm1, %v598_v26  ;;  %v1318_v33 = vpop.f32.mrf.mxu2  ;;  %v587_v41 = vmul.f32 %v1006_v34, %v586_v37  ;;  %v488_v26 = vpop.f32.mrf.mxu3 }
 0x44a   :  { %v709_v27 = vpop.f32.mrf.mxu1  ;;  %v588_v42 = vadd.f32 %v1006_v34, %v587_v41 }
 0x44b   :  { %v740_v28 = vmul.f32 0.35355338, %v709_v27 }
 0x44c   :  { %v592_v49 = vsel %vm591_vm9, %v1006_v34, %v588_v42 }
 0x44d   :  { %877 = vst.msk [vmem:[#allocation9 + $0x18] sm:$0xff] %vm122_vm1, %v740_v28  ;;  %v742_v29 = vsel %vm122_vm1, %v740_v28, -inf  ;;  %v597_v43 = vsel %vm594_vm10, %v596_v50, %v592_v49 }
 0x44e   :  { %743 = vmax.xlane.f32.xlu0 %v742_v29  ;;  %v599_v54 = vmul.f32 %v1305_v10, %v597_v43  ;;  %v842_v10 = vld [vmem:[#allocation7 + $0x18] sm:$0xff] }
 0x44f   :  { %864 = vmatpush.msra.mxu2 %v842_v10 }
 0x450   :  { %958 = vmatmul.msk.f32.vlgmr.msrb.gmra.mxu2 %vm122_vm1, %v713_v30  ;;  %v1320_v39 = vpop.f32.mrf.mxu2  ;;  %v491_v27 = vpop.f32.mrf.mxu3  ;;  %v489_v30 = vadd.f32 %v488_v26, %v1318_v33 }
 0x451   :  { %v492_v37 = vadd.f32 %v491_v27, %v1320_v39 }
 0x462   :  { %626 = vrot.lane.b32.xlu0 %v1221_v18, %s1155_s19 }
 0x4c1   :  { %v744_v36 = vpop.xlane.xlu0 %743 }
 0x4c2   :  { %v748_v38 = vsub.f32 %v740_v28, %v744_v36 }
 0x4c4   :  { %v750_v40 = vmul.f32 1.442695, %v748_v38 }
 0x4c6   :  { %1007 = vpow2.f32 %v750_v40 }
 0x4cb   :  { %v623_v45 = vpop.f32.mrf.mxu2 }
 0x4cc   :  { %v1008_v46 = vpop.eup %1007  ;;  %953 = vmatmul.msk.f32.vlgmr.msra.gmra.mxu3 %vm122_vm1, %v623_v45 }
 0x4cd   :  { %v754_v48 = vsel %vm122_vm1, %v1008_v46, 0.0 }
 0x4ce   :  { %755 = vadd.xlane.f32.xlu2 %v754_v48 }
 0x4d3   :  { %v737_v51 = vpop.f32.mrf.mxu2 }
 0x4d4   :  { %v741_v52 = vmul.f32 0.35355338, %v737_v51  ;;  %v627_v53 = vpop.permute.xlu0 %626 }
 0x4d5   :  { %647 = vmatpush.msra.mxu0 %v627_v53 }
 0x4d6   :  { %881 = vst.msk [vmem:[#allocation9 + $0x38] sm:$0xff] %vm122_vm1, %v741_v52  ;;  %952 = vmatmul.msk.f32.vlgmr.msra.gmra.mxu0 %vm122_vm1, %v599_v54  ;;  %v745_v55 = vsel %vm122_vm1, %v741_v52, -inf }
 0x4d7   :  { %746 = vmax.xlane.f32.xlu1 %v745_v55  ;;  %916 = dma.vmem_to_hbm [thread:$0]  %s909_s26, 1024, %s911_s7, [#allocation10], %s1144_s29, %s1144_s29, %s1145_s30  }
 0x4f0   :  { %790 = vrot.lane.b32.xlu1 %v1217_v16, %s1158_s22 }
 0x541   :  { %v756_v56 = vpop.xlane.xlu2 %755 }
 0x542   :  { %1009 = vrcp.f32 %v756_v56  ;;  %v771_v16 = vand.u32 2147483648, %v756_v56  ;;  %vm765_vm12 = vweird.f32 %v756_v56  ;;  %v769_v4 = vand.u32 2147483647, %v756_v56 }
 0x544   :  { %v772_v6 = vor.u32 1.1754944e-38, %v771_v16  ;;  %vm770_vm14 = vcmp.eq.f32.partialorder %v769_v4, 8.507059e+37 }
 0x548   :  { %v1010_v57 = vpop.eup %1009 }
 0x549   :  { %v761_v60 = vmul.f32 %v1010_v57, %v756_v56  ;;  %vm766_vm11 = vweird.f32 %v1010_v57 }
 0x54a   :  { %v747_v58 = vpop.xlane.xlu1 %746  ;;  %vm767_vm13 = vmor %vm765_vm12, %vm766_vm11 }
 0x54b   :  { %v749_v59 = vsub.f32 %v741_v52, %v747_v58  ;;  %v762_v62 = vsub.f32 1.0, %v761_v60 }
 0x54d   :  { %v752_v61 = vmul.f32 1.442695, %v749_v59  ;;  %v763_v0 = vmul.f32 %v1010_v57, %v762_v62 }
 0x54f   :  { %1011 = vpow2.f32 %v752_v61  ;;  %v764_v3 = vadd.f32 %v1010_v57, %v763_v0  ;;  %v676_v29 = vpop.f32.mrf.mxu3 }
 0x550   :  { %v682_v31 = vadd.f32 %v676_v29, %v489_v30 }
 0x551   :  { %v768_v5 = vsel %vm767_vm13, %v1010_v57, %v764_v3 }
 0x552   :  { %v773_v7 = vsel %vm770_vm14, %v772_v6, %v768_v5 }
 0x553   :  { %v649_v63 = vpop.f32.mrf.mxu0  ;;  %v788_v9 = vmul.f32 %v1008_v46, %v773_v7 }
 0x554   :  { %954 = vmatmul.msk.f32.gmra.mxu3 %vm122_vm1, %v649_v63 }
 0x555   :  { %v1012_v1 = vpop.eup %1011 }
 0x556   :  { %v757_v2 = vsel %vm122_vm1, %v1012_v1, 0.0 }
 0x557   :  { %758 = vadd.xlane.f32.xlu2 %v757_v2 }
 0x562   :  { %v791_v8 = vpop.permute.xlu1 %790 }
 0x563   :  { %811 = vmatpush.msrb.mxu0 %v791_v8 }
 0x564   :  { %959 = vmatmul.msk.f32.vlgmr.msrb.gmra.mxu0 %vm122_vm1, %v788_v9 }
 0x56f   :  { %816 = vrot.lane.b32.xlu2 %v1221_v18, %s1158_s22 }
 0x5ca   :  { %v759_v11 = vpop.xlane.xlu2 %758 }
 0x5cb   :  { %1013 = vrcp.f32 %v759_v11  ;;  %v785_v17 = vand.u32 2147483648, %v759_v11  ;;  %v783_v20 = vand.u32 2147483647, %v759_v11  ;;  %vm779_vm0 = vweird.f32 %v759_v11 }
 0x5cd   :  { %v786_v22 = vor.u32 1.1754944e-38, %v785_v17  ;;  %vm784_vm3 = vcmp.eq.f32.partialorder %v783_v20, 8.507059e+37 }
 0x5d1   :  { %v1014_v12 = vpop.eup %1013 }
 0x5d2   :  { %v775_v13 = vmul.f32 %v1014_v12, %v759_v11  ;;  %v817_v14 = vpop.permute.xlu2 %816  ;;  %vm780_vm15 = vweird.f32 %v1014_v12 }
 0x5d3   :  { %837 = vmatpush.msra.mxu1 %v817_v14  ;;  %vm781_vm2 = vmor %vm779_vm0, %vm780_vm15 }
 0x5d4   :  { %v776_v15 = vsub.f32 1.0, %v775_v13 }
 0x5d6   :  { %v777_v19 = vmul.f32 %v1014_v12, %v776_v15 }
 0x5d7   :  { %v679_v33 = vpop.f32.mrf.mxu3 }
 0x5d8   :  { %v778_v21 = vadd.f32 %v1014_v12, %v777_v19  ;;  %v683_v38 = vadd.f32 %v679_v33, %v492_v37 }
 0x5da   :  { %v782_v23 = vsel %vm781_vm2, %v1014_v12, %v778_v21 }
 0x5db   :  { %v787_v18 = vsel %vm784_vm3, %v786_v22, %v782_v23 }
 0x5dc   :  { %v789_v24 = vmul.f32 %v1012_v1, %v787_v18 }
 0x5de   :  { %960 = vmatmul.msk.f32.vlgmr.msra.gmra.mxu1 %vm122_vm1, %v789_v24 }
 0x5e1   :  { %v813_v25 = vpop.f32.mrf.mxu0 }
 0x5e2   :  { %961 = vmatmul.msk.f32.vlgmr.msra.gmra.mxu2 %vm122_vm1, %v813_v25 }
 0x65b   :  { %v839_v28 = vpop.f32.mrf.mxu1 }
 0x65c   :  { %962 = vmatmul.msk.f32.gmra.mxu2 %vm122_vm1, %v839_v28 }
 0x665   :  { %v866_v34 = vpop.f32.mrf.mxu2 }
 0x666   :  { %v872_v35 = vadd.f32 %v866_v34, %v682_v31 }
 0x668   :  { %v886_v36 = vadd.f32 %v982_v32, %v872_v35 }
 0x66a   :  { %889 = vst.msk [vmem:[#allocation8] sm:$0xff] %vm888_vm4, %v886_v36 }
 0x6df   :  { %v869_v40 = vpop.f32.mrf.mxu2 }
 0x6e0   :  { %v873_v41 = vadd.f32 %v869_v40, %v683_v38 }
 0x6e2   :  { %v887_v42 = vadd.f32 %v982_v32, %v873_v41 }
 0x6e4   :  { %890 = vst.msk [vmem:[#allocation8 + $0x8] sm:$0xff] %vm888_vm4, %v887_v42 }
 0x6e5   :  { %903 = dma.vmem_to_hbm [thread:$0]  %s896_s8, 256, %s898_s6, [#allocation4], %s1144_s29, %s1144_s29, %s1145_s30  }
 0x6e6   :  { %1139 = dma.done.wait [#allocation4], 256  }
 0x6e7   :  { %1140 = vsyncadd [#allocation4], 4294967040 }
 0x6e8   :  { %1141 = dma.done.wait [#allocation10], 1024  }
 0x6e9   :  { %1142 = vsyncadd [#allocation10], 4294966272 }
 0x6ea   :  { %925 = vsyncpa [#allocation3], 1 }
 0x6eb   :  { %926 = vsyncpa [#allocation6], 1 }
 0x6ec   :  { %927 = vsyncpa [#allocation4], 1 }
 0x6ed   :  { %928 = vsyncpa [#allocation10], 1 }

</bundles_post_ra>
